<compile_context>
chip_gen: v7x
topology: tpu7x:2x2x1
jax: 0.10.0
libtpu: 0.0.40
codegen_flags: <defaults>
</compile_context>

<pallas_src>
import jax
import jax.numpy as jnp
import numpy as np
from jax.experimental import pallas as pl
from jax.experimental.pallas import tpu as pltpu


def _se_block_kernel(x_ref, w1_ref, b1_ref, w2_ref, b2_ref, o_ref):
    """x_ref/o_ref: (N, C, HW); w1: (C, C_red); b1: (1, C_red);
    w2: (C_red, C); b2: (1, C)."""
    x = x_ref[...].astype(jnp.float32)                     # (N, C, HW)

    # Squeeze: global average pool over the lane (spatial) axis.
    pooled = jnp.mean(x, axis=-1)                          # (N, C)

    # Excitation: two small FC layers + sigmoid; batch is the GEMM M axis.
    # TODO(synk): nn.Dropout is identity in eval mode; training-mode dropout
    # (p=0.5 RNG masking) is not implemented here.
    h = jnp.dot(pooled, w1_ref[...],
                preferred_element_type=jnp.float32) + b1_ref[...]       # (N, C_red)
    logits = jnp.dot(h, w2_ref[...],
                     preferred_element_type=jnp.float32) + b2_ref[...]  # (N, C)
    gate = jax.nn.sigmoid(logits)                          # (N, C)

    # Channel-wise rescale; lane-dense store (last dim = HW, multiple of 128).
    o_ref[...] = (x * gate[:, :, None]).astype(o_ref.dtype)


def se_block(x_nchw, w1, b1, w2, b2):
    """SEBlock forward (eval mode).

    x_nchw: (N, C, H, W)     float32
    w1:     (C_red, C)       nn.Linear(channel_in, channel_reduced).weight
    b1:     (C_red,)
    w2:     (C, C_red)       nn.Linear(channel_reduced, channel_out).weight
    b2:     (C,)
    returns (N, C, H, W)
    """
    n, c, h, w = x_nchw.shape
    c_red = w1.shape[0]
    assert w1.shape == (c_red, c) and w2.shape == (c, c_red)
    assert b1.shape == (c_red,) and b2.shape == (c,)
    hw = h * w

    # Glue: flatten spatial so the lane axis is H*W; pre-transpose weights so
    # kernel matmuls are (M, K) @ (K, N); biases made 2D for VMEM.
    x3 = x_nchw.reshape(n, c, hw)
    w1_t = jnp.transpose(w1)          # (C, C_red)
    w2_t = jnp.transpose(w2)          # (C_red, C)
    b1_2d = b1.reshape(1, c_red)
    b2_2d = b2.reshape(1, c)

    itemsize = jnp.dtype(x_nchw.dtype).itemsize
    cost = pl.CostEstimate(
        flops=2 * n * c * hw                      # pool reduce + rescale mul
        + 2 * n * c * c_red * 2,                  # two FC layers
        transcendentals=n * c,                    # sigmoid
        bytes_accessed=(2 * x3.size + w1.size + b1.size + w2.size + b2.size)
        * itemsize,
    )

    out3 = pl.pallas_call(
        _se_block_kernel,
        out_shape=jax.ShapeDtypeStruct((n, c, hw), x_nchw.dtype),
        grid=(1,),
        in_specs=[
            pl.BlockSpec((n, c, hw), lambda i: (0, 0, 0)),
            pl.BlockSpec((c, c_red), lambda i: (0, 0)),
            pl.BlockSpec((1, c_red), lambda i: (0, 0)),
            pl.BlockSpec((c_red, c), lambda i: (0, 0)),
            pl.BlockSpec((1, c), lambda i: (0, 0)),
        ],
        out_specs=pl.BlockSpec((n, c, hw), lambda i: (0, 0, 0)),
        compiler_params=pltpu.CompilerParams(
            dimension_semantics=("arbitrary",)),
        cost_estimate=cost,
    )(x3, w1_t, b1_2d, w2_t, b2_2d)

    return out3.reshape(n, c, h, w)


if __name__ == "__main__":
    # Module config: channel_in == channel_out (required by channel_weights * x),
    # se_ratio reduces the hidden width of the excitation MLP.
    batch, channels, spatial = 2, 4, 16
    se_ratio = 0.5
    channel_reduced = int(channels * se_ratio)   # 2

    key = jax.random.PRNGKey(0)
    kx, k1, k2, k3, k4 = jax.random.split(key, 5)
    x = jax.random.normal(kx, (batch, channels, spatial, spatial), jnp.float32)
    w1 = jax.random.normal(k1, (channel_reduced, channels), jnp.float32) * 0.3
    b1 = jax.random.normal(k2, (channel_reduced,), jnp.float32) * 0.1
    w2 = jax.random.normal(k3, (channels, channel_reduced), jnp.float32) * 0.3
    b2 = jax.random.normal(k4, (channels,), jnp.float32) * 0.1

    out = se_block(x, w1, b1, w2, b2)
    out = jax.block_until_ready(out)

    # Pure-JAX reference (eval-mode SEBlock).
    pooled = x.mean(axis=(2, 3))
    gate = jax.nn.sigmoid((pooled @ w1.T + b1) @ w2.T + b2)
    ref = gate[:, :, None, None] * x
    np.testing.assert_allclose(np.asarray(out), np.asarray(ref),
                               rtol=1e-5, atol=1e-5)

    print("KERNEL_OK")
</pallas_src>

<mosaic_0001>
module attributes {stable_mosaic.version = 11 : i64} {
  func.func @_se_block_kernel(%arg0: i32, %arg1: memref<2x4x256xf32, #tpu.memory_space<vmem>>, %arg2: memref<4x2xf32, #tpu.memory_space<vmem>>, %arg3: memref<1x2xf32, #tpu.memory_space<vmem>>, %arg4: memref<2x4xf32, #tpu.memory_space<vmem>>, %arg5: memref<1x4xf32, #tpu.memory_space<vmem>>, %arg6: memref<2x4x256xf32, #tpu.memory_space<vmem>>) attributes {dimension_semantics = [#tpu.dimension_semantics<arbitrary>], iteration_bounds = array<i64: 1>, scalar_prefetch = 0 : i64, scratch_operands = 0 : i64, tpu.core_type = #tpu.core_type<tc>, window_params = [{pipeline_mode = #tpu.pipeline_mode<synchronous>, transform_indices = @transform_0, window_bounds = array<i64: 2, 4, 256>}, {pipeline_mode = #tpu.pipeline_mode<synchronous>, transform_indices = @transform_1, window_bounds = array<i64: 4, 2>}, {pipeline_mode = #tpu.pipeline_mode<synchronous>, transform_indices = @transform_2, window_bounds = array<i64: 1, 2>}, {pipeline_mode = #tpu.pipeline_mode<synchronous>, transform_indices = @transform_3, window_bounds = array<i64: 2, 4>}, {pipeline_mode = #tpu.pipeline_mode<synchronous>, transform_indices = @transform_4, window_bounds = array<i64: 1, 4>}, {pipeline_mode = #tpu.pipeline_mode<synchronous>, transform_indices = @transform_5, window_bounds = array<i64: 2, 4, 256>}]} {
    %c0 = arith.constant 0 : index
    %c0_0 = arith.constant 0 : index
    %c0_1 = arith.constant 0 : index
    %0 = vector.load %arg1[%c0, %c0_0, %c0_1] : memref<2x4x256xf32, #tpu.memory_space<vmem>>, vector<2x4x256xf32>
    %cst = arith.constant dense<0.000000e+00> : vector<2x4xf32>
    %1 = vector.multi_reduction <add>, %0, %cst [2] : vector<2x4x256xf32> to vector<2x4xf32>
    %cst_2 = arith.constant 2.560000e+02 : f32
    %2 = vector.broadcast %cst_2 : f32 to vector<2x4xf32>
    %3 = arith.divf %1, %2 : vector<2x4xf32>
    %c0_3 = arith.constant 0 : index
    %c0_4 = arith.constant 0 : index
    %4 = vector.load %arg2[%c0_3, %c0_4] : memref<4x2xf32, #tpu.memory_space<vmem>>, vector<4x2xf32>
    %cst_5 = arith.constant dense<0.000000e+00> : vector<2x2xf32>
    %5 = tpu.matmul %3, %4, %cst_5 {dimension_numbers = #tpu.dot_dimension_numbers<[1], [0], [0], [1], [0, 0, 1, 1], [], []>} : vector<2x4xf32>, vector<4x2xf32>, vector<2x2xf32> -> vector<2x2xf32>
    %c0_6 = arith.constant 0 : index
    %c0_7 = arith.constant 0 : index
    %6 = vector.load %arg3[%c0_6, %c0_7] : memref<1x2xf32, #tpu.memory_space<vmem>>, vector<1x2xf32>
    %7 = vector.broadcast %6 : vector<1x2xf32> to vector<2x2xf32>
    %8 = arith.addf %5, %7 : vector<2x2xf32>
    %c0_8 = arith.constant 0 : index
    %c0_9 = arith.constant 0 : index
    %9 = vector.load %arg4[%c0_8, %c0_9] : memref<2x4xf32, #tpu.memory_space<vmem>>, vector<2x4xf32>
    %cst_10 = arith.constant dense<0.000000e+00> : vector<2x4xf32>
    %10 = tpu.matmul %8, %9, %cst_10 {dimension_numbers = #tpu.dot_dimension_numbers<[1], [0], [0], [1], [0, 0, 1, 1], [], []>} : vector<2x2xf32>, vector<2x4xf32>, vector<2x4xf32> -> vector<2x4xf32>
    %c0_11 = arith.constant 0 : index
    %c0_12 = arith.constant 0 : index
    %11 = vector.load %arg5[%c0_11, %c0_12] : memref<1x4xf32, #tpu.memory_space<vmem>>, vector<1x4xf32>
    %12 = vector.broadcast %11 : vector<1x4xf32> to vector<2x4xf32>
    %13 = arith.addf %10, %12 : vector<2x4xf32>
    %14 = arith.negf %13 : vector<2x4xf32>
    %15 = math.exp %14 : vector<2x4xf32>
    %cst_13 = arith.constant 1.000000e+00 : f32
    %16 = vector.broadcast %cst_13 : f32 to vector<2x4xf32>
    %17 = arith.addf %16, %15 : vector<2x4xf32>
    %18 = arith.divf %16, %17 : vector<2x4xf32>
    %19 = vector.shape_cast %18 : vector<2x4xf32> to vector<2x4x1xf32>
    %20 = vector.broadcast %19 : vector<2x4x1xf32> to vector<2x4x256xf32>
    %21 = arith.mulf %0, %20 : vector<2x4x256xf32>
    %c0_14 = arith.constant 0 : index
    %c0_15 = arith.constant 0 : index
    %c0_16 = arith.constant 0 : index
    %22 = vector.load %arg6[%c0_14, %c0_15, %c0_16] : memref<2x4x256xf32, #tpu.memory_space<vmem>>, vector<2x4x256xf32>
    tpu.vector_store %arg6[%c0_14, %c0_15, %c0_16], %21 {strides = array<i32>} : memref<2x4x256xf32, #tpu.memory_space<vmem>>, vector<2x4x256xf32>,
    return
  }
  func.func @transform_0(%arg0: i32) -> (i32, i32, i32) {
    %c0_i32 = arith.constant 0 : i32
    %c0_i32_0 = arith.constant 0 : i32
    %c0_i32_1 = arith.constant 0 : i32
    %c0_i32_2 = arith.constant 0 : i32
    return %c0_i32, %c0_i32_0, %c0_i32_1 : i32, i32, i32
  }
  func.func @transform_1(%arg0: i32) -> (i32, i32) {
    %c0_i32 = arith.constant 0 : i32
    %c0_i32_0 = arith.constant 0 : i32
    %c0_i32_1 = arith.constant 0 : i32
    return %c0_i32, %c0_i32_0 : i32, i32
  }
  func.func @transform_2(%arg0: i32) -> (i32, i32) {
    %c0_i32 = arith.constant 0 : i32
    %c0_i32_0 = arith.constant 0 : i32
    %c0_i32_1 = arith.constant 0 : i32
    return %c0_i32, %c0_i32_0 : i32, i32
  }
  func.func @transform_3(%arg0: i32) -> (i32, i32) {
    %c0_i32 = arith.constant 0 : i32
    %c0_i32_0 = arith.constant 0 : i32
    %c0_i32_1 = arith.constant 0 : i32
    return %c0_i32, %c0_i32_0 : i32, i32
  }
  func.func @transform_4(%arg0: i32) -> (i32, i32) {
    %c0_i32 = arith.constant 0 : i32
    %c0_i32_0 = arith.constant 0 : i32
    %c0_i32_1 = arith.constant 0 : i32
    return %c0_i32, %c0_i32_0 : i32, i32
  }
  func.func @transform_5(%arg0: i32) -> (i32, i32, i32) {
    %c0_i32 = arith.constant 0 : i32
    %c0_i32_0 = arith.constant 0 : i32
    %c0_i32_1 = arith.constant 0 : i32
    %c0_i32_2 = arith.constant 0 : i32
    return %c0_i32, %c0_i32_0, %c0_i32_1 : i32, i32, i32
  }
}

</mosaic_0001>

<bundles_post_ra>
// kernel: tpu_custom_call.1
= control target key start
LH: loop header
LB: loop body
LE: loop exit
PB: predicated region body
PF: predicated region fallthrough
CT: control target
= control target key end

     0   :  { %10 = vsyncpa [#allocation3], 0  ;;  %s478_s0 = inlined_call_operand.hbm [shape: f32[2,4,256], index: 0, kind: input, shape index: {}]   ;;  %s479_s1 = inlined_call_operand.vmem [shape: f32[4,2], index: 1, kind: input, shape index: {}]   ;;  %s480_s2 = inlined_call_operand.vmem [shape: f32[1,2], index: 2, kind: input, shape index: {}]   ;;  %s481_s3 = inlined_call_operand.vmem [shape: f32[2,4], index: 3, kind: input, shape index: {}]   ;;  %s482_s4 = inlined_call_operand.vmem [shape: f32[1,4], index: 4, kind: input, shape index: {}]   ;;  %s483_s5 = inlined_call_operand.hbm [shape: f32[2,4,256], index: 5, kind: output, shape index: {}]  }
   0x1   :  { %11 = vsyncpa [#allocation4], 0  ;;  %s382_s18 = smov [#allocation2]   ;;  %s334_s22 = scalar_lea.hbm %s478_s0, 256 }
   0x2   :  { %s17_s19 = sshll.u32 %s382_s18, 4  ;;  %p335_p0 = scmp.ne.s32.totalorder %s478_s0, %s334_s22  ;;  %s18_s19 = int_to_ptr.vmem [resolvable:$true] %s17_s19 }
   0x3   :  { %p338_p1 = scmp.lt.u32.totalorder %s334_s22, %s478_s0 }
   0x5   :  { %p340_p2 = pnand %p338_p1, %p335_p0 }
   0x7   :  { %343 = shalt.err (!%p340_p2)
}
   0x8   :  { %s344_s27 = scalar_lea.vmem %s18_s19, 256  ;;  %p349_p4 = scmp.lt.s32.totalorder %s18_s19, %s18_s19 }
   0x9   :  { %p345_p3 = scmp.ne.s32.totalorder %s18_s19, %s344_s27  ;;  %p350_p5 = scmp.lt.s32.totalorder %s344_s27, %s344_s27 }
   0xb   :  { %p351_p6 = por %p350_p5, %p349_p4 }
   0xd   :  { %p352_p7 = pnand %p351_p6, %p345_p3 }
   0xf   :  { %355 = shalt.err (!%p352_p7)
}
  0x10   :  { %s383_s28 = smov 128   ;;  %s384_s29 = smov 8  }
  0x11   :  { %23 = dma.hbm_to_vmem [thread:$0]  %s478_s0, 256, %s18_s19, [#allocation3], %s383_s28, %s383_s28, %s384_s29  }
  0x12   :  { %378 = dma.done.wait [#allocation3], 256  }
  0x13   :  { %379 = vsyncadd [#allocation3], 4294967040  ;;  %vm43_vm0 = vcmask 1043456   ;;  %v434_v0 = vld [vmem:[#allocation2] sm:$0xff]  ;;  %v436_v1 = vld [vmem:[#allocation2 + $0x8] sm:$0xff]  ;;  %v385_v11 = vmov 0.0   ;;  %v67_v12 = vlaneseq }
  0x14   :  { %v39_v2 = vcombine.high %v434_v0, %v434_v0  ;;  %v44_v3 = vsel %vm43_vm0, %v434_v0, 0.0  ;;  %v40_v4 = vcombine.high %v436_v1, %v436_v1  ;;  %v49_v6 = vsel %vm43_vm0, %v436_v1, 0.0  ;;  %v57_v10 = vld [vmem:[%s479_s1] sm:$0xf]  ;;  %311 = vmatprep.subr.mxu0 %v385_v11  ;;  %316 = vmatprep.subr.mxu1 %v385_v11 }
  0x15   :  { %vm386_vm1 = vmmov 0   ;;  %312 = vmatpush3.msk.msra.mxu0 %vm43_vm0, %v57_v10  ;;  %v68_v13 = vand.u32 127, %v67_v12  ;;  %v70_v14 = vshrl.u32 %v67_v12, 7  ;;  %vm77_vm2 = vcmask 1041409   ;;  %v155_v23 = vld [vmem:[%s481_s3] sm:$0x3] }
  0x16   :  { %v45_v5 = vsel %vm43_vm0, %v39_v2, 0.0  ;;  %v50_v7 = vsel %vm43_vm0, %v40_v4, 0.0  ;;  %313 = vmatprep.mubr.msk.f32.mxu0 %vm386_vm1, %v385_v11  ;;  %318 = vmatprep.mubr.msk.f32.mxu1 %vm386_vm1, %v385_v11  ;;  %vm79_vm3 = vcmask 31744   ;;  %vm167_vm4 = vcmask 1041408   ;;  %v300_v24 = vld [vmem:[%s480_s2] ss:$0 sm:$0xff] }
  0x17   :  { %v46_v8 = vadd.f32 %v45_v5, %v44_v3  ;;  %v51_v9 = vadd.f32 %v50_v7, %v49_v6  ;;  %v71_v16 = vsub.s32 %v68_v13, %v70_v14  ;;  %317 = vmatpush3.msk.msra.mxu1 %vm167_vm4, %v155_v23  ;;  %vm163_vm5 = vcmask 15360   ;;  %v303_v28 = vld [vmem:[%s482_s4] ss:$0 sm:$0xff]  ;;  %s388_s2 = smov [#allocation5]  }
  0x18   :  { %v249_v35 = vsub.s32 0, %v70_v14  ;;  %v256_v38 = vsub.s32 1, %v70_v14  ;;  %v387_v40 = vmov 839922192   ;;  %s288_s3 = sshll.u32 %s388_s2, 4  ;;  %s289_s3 = int_to_ptr.vmem [resolvable:$true] %s288_s3 }
  0x19   :  { %47 = vadd.xlane.f32.xlu0 %v46_v8  ;;  %v264_v41 = vunpack.c.l.s4 %v387_v40  ;;  %s356_s4 = scalar_lea.vmem %s289_s3, 256  ;;  %p361_p9 = scmp.lt.s32.totalorder %s289_s3, %s289_s3 }
  0x1a   :  { %p357_p8 = scmp.ne.s32.totalorder %s289_s3, %s356_s4  ;;  %p362_p10 = scmp.lt.s32.totalorder %s356_s4, %s356_s4 }
  0x1b   :  { %v265_v42 = vunpack.c.0.s8 %v264_v41 }
  0x1c   :  { %p363_p11 = por %p362_p10, %p361_p9 }
  0x1d   :  { %52 = vadd.xlane.f32.xlu0 %v51_v9  ;;  %v268_v43 = vsub.s32 %v265_v42, %v70_v14 }
  0x1e   :  { %p364_p12 = pnand %p363_p11, %p357_p8 }
  0xa6   :  { %v48_v15 = vpop.xlane.xlu0 %47 }
  0xa7   :  { %v55_v17 = vmul.f32 0.00390625, %v48_v15 }
  0xa9   :  { %v72_v20 = vrot.slane %v55_v17, %v71_v16 }
  0xaa   :  { %v53_v18 = vpop.xlane.xlu0 %52 }
  0xab   :  { %v56_v19 = vmul.f32 0.00390625, %v53_v18 }
  0xad   :  { %v76_v21 = vrot.slane %v56_v19, %v71_v16 }
  0xaf   :  { %v78_v22 = vsel %vm77_vm2, %v76_v21, %v72_v20 }
  0xb0   :  { %314 = vmatmul.mubr.msk.f32.vlgmr.msra.gmra.mrb[0].mxu0 %vm79_vm3, %v78_v22 }
 0x183   :  { %v151_v25 = vpop.f32.mrb[0].mxu0 }
 0x184   :  { %v152_v26 = vadd.f32 %v300_v24, %v151_v25  ;;  %v315_v27 = vpop.f32.mrb[1].mxu0 }
 0x186   :  { %319 = vmatmul.mubr.msk.f32.vlgmr.msra.gmra.mrb[0].mxu1 %vm163_vm5, %v152_v26 }
 0x259   :  { %v237_v29 = vpop.f32.mrb[0].mxu1 }
 0x25a   :  { %v238_v30 = vadd.f32 %v303_v28, %v237_v29  ;;  %v320_v31 = vpop.f32.mrb[1].mxu1 }
 0x25c   :  { %v306_v32 = vmul.f32 -1.442695, %v238_v30 }
 0x25e   :  { %330 = vpow2.f32 %v306_v32 }
 0x268   :  { %v331_v33 = vpop.eup %330 }
 0x269   :  { %v244_v34 = vadd.f32 1.0, %v331_v33 }
 0x26b   :  { %332 = vrcp.f32 %v244_v34 }
 0x275   :  { %v333_v36 = vpop.eup %332 }
 0x276   :  { %v250_v37 = vrot.slane %v333_v36, %v249_v35  ;;  %v257_v39 = vrot.slane %v333_v36, %v256_v38 }
 0x278   :  { %252 = vbcast.lane.b32.xlu1 %v250_v37, 256 }
 0x27c   :  { %259 = vbcast.lane.b32.xlu1 %v257_v39, 256 }
 0x2ea   :  { %v253_v44 = vpop.permute.xlu1 %252 }
 0x2eb   :  { %v269_v45 = vrot.slane %v253_v44, %v268_v43 }
 0x2ed   :  { %v279_v46 = vmul.f32 %v269_v45, %v434_v0 }
 0x2ee   :  { %v260_v47 = vpop.permute.xlu1 %259 }
 0x2ef   :  { %281 = vst [vmem:[#allocation5] sm:$0xff] %v279_v46  ;;  %v276_v48 = vrot.slane %v260_v47, %v268_v43 }
 0x2f1   :  { %v280_v49 = vmul.f32 %v276_v48, %v436_v1 }
 0x2f3   :  { %282 = vst [vmem:[#allocation5 + $0x8] sm:$0xff] %v280_v49 }
 0x2f4   :  { %367 = shalt.err (!%p364_p12)
}
 0x2f5   :  { %s368_s15 = scalar_lea.hbm %s483_s5, 256 }
 0x2f6   :  { %p369_p13 = scmp.ne.s32.totalorder %s483_s5, %s368_s15  ;;  %p372_p0 = scmp.lt.u32.totalorder %s368_s15, %s483_s5 }
 0x2f8   :  { %p374_p1 = pnand %p372_p0, %p369_p13 }
 0x2fa   :  { %377 = shalt.err (!%p374_p1)
}
 0x2fb   :  { %294 = dma.vmem_to_hbm [thread:$0]  %s289_s3, 256, %s483_s5, [#allocation4], %s383_s28, %s383_s28, %s384_s29  }
 0x2fc   :  { %380 = dma.done.wait [#allocation4], 256  }
 0x2fd   :  { %381 = vsyncadd [#allocation4], 4294967040 }
 0x2fe   :  { %298 = vsyncpa [#allocation3], 1 }
 0x2ff   :  { %299 = vsyncpa [#allocation4], 1 }

</bundles_post_ra>
